<compile_context>
chip_gen: v5e
topology: v5e:2x2
jax: 0.10.0
libtpu: 0.0.40
codegen_flags: <defaults>
</compile_context>

<pallas_src>
import functools

import jax
import jax.numpy as jnp
from jax import lax
from jax.experimental import pallas as pl
from jax.experimental.pallas import tpu as pltpu


def _classifier_kernel(tgt_ref, x_ref,
                       wih_ref, brnn_ref, whh_ref,
                       w1_ref, b1_ref, w2_ref, b2_ref,
                       out_ref,
                       xw_sc, g_sc,
                       *, apply_softmax: bool, unroll: bool):
    """tgt_ref: (Bt, 1) i32 (= lengths - 1, -1 for padded rows),
    x_ref: (S, Bt, Ep) bf16 time-major embedded tokens,
    out_ref: (Bt, Cpad) f32,
    xw_sc: (S*Bt, Hp) f32 scratch, g_sc: (Bt, Hp) f32 scratch (gathered hidden state)."""
    S, Bt, Ep = x_ref.shape
    Hp = whh_ref.shape[0]

    # --- hoisted input projection: ONE big bf16 MXU matmul + fused (b_ih + b_hh) bias ---
    # (S, Bt, Ep) -> (S*Bt, Ep) is a (8,128)-aligned, contiguity-preserving collapse.
    x2 = x_ref[...].reshape(S * Bt, Ep)                           # already bf16 (wrapper cast)
    xw_sc[...] = (jnp.dot(x2, wih_ref[...], preferred_element_type=jnp.float32)
                  + brnn_ref[...])

    tgt = tgt_ref[...]                                            # (Bt, 1) i32, loaded once
    g_sc[...] = jnp.zeros_like(g_sc)                              # gathered state lives in VMEM

    def step(t, h_prev):
        base = pl.multiple_of(t * Bt, Bt)
        xw_t = xw_sc[pl.ds(base, Bt), :]                          # (Bt, Hp) f32, lane-dense
        # serial critical path: one MXU push (RHS read from VMEM, not vregs) + add + tanh
        h_new = jnp.tanh(
            xw_t + jnp.dot(h_prev.astype(whh_ref.dtype), whh_ref[...],
                           preferred_element_type=jnp.float32))
        # column_gather: masked store of the hidden state at position (length - 1) per row;
        # store-slot filler hidden under the MXU/EUP latency, keeps g out of the loop carry.
        pltpu.store(g_sc, h_new, mask=jnp.broadcast_to(tgt == t, (Bt, Hp)))
        return h_new

    h0 = jnp.zeros((Bt, Hp), jnp.float32)
    lax.fori_loop(0, S, step, h0, unroll=unroll)

    # fc1 + ReLU  (dropout treated as identity, see TODO above); pad lanes stay exactly 0.
    y = g_sc[...]
    y = jnp.maximum(
        jnp.dot(y.astype(w1_ref.dtype), w1_ref[...],
                preferred_element_type=jnp.float32) + b1_ref[...], 0.0)
    # fc2 into a lane-dense (Bt, Cpad) slab; padded bias lanes are -1e30 so softmax ignores them.
    logits = jnp.dot(y.astype(w2_ref.dtype), w2_ref[...],
                     preferred_element_type=jnp.float32) + b2_ref[...]

    if apply_softmax:
        m = jnp.max(logits, axis=1, keepdims=True)
        e = jnp.exp(logits - m)
        logits = e * pl.reciprocal(jnp.sum(e, axis=1, keepdims=True), approx=True)

    out_ref[...] = logits.astype(out_ref.dtype)


def _round_up(n, m):
    return ((n + m - 1) // m) * m


def _choose_batch_tiling(B):
    """Sublane-aligned (multiple-of-8) batch tile <= 128.  Prefer >= 2 tiles so both
    TensorCores on v7x get work; on single-core v5e/v6e the extra tile only costs ~0.35us."""
    Bpad = max(8, _round_up(B, 8))
    divisors = [d for d in range(8, min(Bpad, 128) + 1, 8) if Bpad % d == 0]
    multi = [d for d in divisors if Bpad // d >= 2]
    Bt = max(multi) if multi else max(divisors)
    return Bpad, Bt


def surname_classifier_forward(x_in, x_lengths, params, apply_softmax=False):
    """x_in: (B, S) int32 token ids, x_lengths: (B,) int32 valid lengths."""
    B, S = x_in.shape
    emb_table = params["emb"]                                     # (V, E), row 0 = padding_idx
    V, E = emb_table.shape
    H = params["rnn_w_hh"].shape[0]
    C = params["fc2_w"].shape[0]

    Ep = _round_up(E, 128)                                        # lane-dense contraction dims
    Hp = _round_up(H, 128)
    Cp = _round_up(C, 128)
    Bpad, Bt = _choose_batch_tiling(B)

    # --- batch padding: pad rows use token 0 (padding_idx) and tgt = -1 (never gathered) ---
    if Bpad != B:
        x_in = jnp.pad(x_in, ((0, Bpad - B), (0, 0)))
    tgt = jnp.full((Bpad, 1), -1, jnp.int32).at[:B, 0].set(x_lengths.astype(jnp.int32) - 1)

    # --- glue in plain JAX: lane-pad + bf16-cast the embedding table, transpose the int32 ids
    #     (cheap), then gather -> the streamed activation tile is bf16 and lane-dense. ---
    emb_p = jnp.zeros((V, Ep), jnp.bfloat16).at[:, :E].set(emb_table.astype(jnp.bfloat16))
    x_tm = jnp.take(emb_p, x_in.T, axis=0)                        # (S, Bpad, Ep) bf16 time-major

    def pad2(w, r, c):
        return jnp.zeros((r, c), w.dtype).at[:w.shape[0], :w.shape[1]].set(w)

    # weights pre-transposed to (in, out), zero-padded to lane-dense shapes, bf16 MXU operands
    wih = pad2(params["rnn_w_ih"].T, Ep, Hp).astype(jnp.bfloat16)              # (Ep, Hp)
    whh = pad2(params["rnn_w_hh"].T, Hp, Hp).astype(jnp.bfloat16)              # (Hp, Hp)
    b_rnn = pad2((params["rnn_b_ih"] + params["rnn_b_hh"]).reshape(1, H), 1, Hp
                 ).astype(jnp.float32)                                          # (1, Hp)
    w1 = pad2(params["fc1_w"].T, Hp, Hp).astype(jnp.bfloat16)                  # (Hp, Hp)
    b1 = pad2(params["fc1_b"].reshape(1, H), 1, Hp).astype(jnp.float32)        # (1, Hp)
    w2 = pad2(params["fc2_w"].T, Hp, Cp).astype(jnp.bfloat16)                  # (Hp, Cp)
    b2 = jnp.full((1, Cp), -1e30, jnp.float32).at[0, :C].set(params["fc2_b"])  # (1, Cp)

    # unroll the serial recurrence only when the unrolled live set stays small
    unroll = (S <= 16) and (Bt * Hp * 4 <= 64 * 1024)

    # --- explicit per-tile VMEM budget -> vmem_limit_bytes (double-buffered inputs/weights) ---
    est = (
        2 * S * Bt * Ep * 2                                       # x tile (bf16), 2 buffers
        + 2 * (Ep * Hp + 2 * Hp * Hp + Hp * Cp) * 2               # weights (bf16), 2 buffers
        + 2 * 8 * (3 * Hp + Cp + 128) * 4                         # biases / tgt (padded tiles)
        + S * Bt * Hp * 4 + Bt * Hp * 4                           # xw_sc + g_sc scratch (f32)
        + 2 * Bt * Cp * 4                                         # output tile, 2 buffers
    )
    vmem_limit = max(32 << 20, min(int(est * 1.5) + (4 << 20), 112 << 20))

    kernel = functools.partial(_classifier_kernel,
                               apply_softmax=apply_softmax, unroll=unroll)

    out = pl.pallas_call(
        kernel,
        out_shape=jax.ShapeDtypeStruct((Bpad, Cp), jnp.float32),
        grid_spec=pltpu.PrefetchScalarGridSpec(
            num_scalar_prefetch=0,
            grid=(Bpad // Bt,),
            in_specs=[
                pl.BlockSpec((Bt, 1), lambda i: (i, 0)),          # lengths - 1 (-1 for pad rows)
                pl.BlockSpec((S, Bt, Ep), lambda i: (0, i, 0)),   # embedded tokens (bf16, TM)
                pl.BlockSpec((Ep, Hp), lambda i: (0, 0)),         # W_ih (full extent)
                pl.BlockSpec((1, Hp), lambda i: (0, 0)),          # b_ih + b_hh
                pl.BlockSpec((Hp, Hp), lambda i: (0, 0)),         # W_hh
                pl.BlockSpec((Hp, Hp), lambda i: (0, 0)),         # fc1 W
                pl.BlockSpec((1, Hp), lambda i: (0, 0)),          # fc1 b
                pl.BlockSpec((Hp, Cp), lambda i: (0, 0)),         # fc2 W (lane-padded)
                pl.BlockSpec((1, Cp), lambda i: (0, 0)),          # fc2 b (pad lanes = -1e30)
            ],
            out_specs=pl.BlockSpec((Bt, Cp), lambda i: (i, 0)),
            scratch_shapes=[
                pltpu.VMEM((S * Bt, Hp), jnp.float32),            # hoisted input projection
                pltpu.VMEM((Bt, Hp), jnp.float32),                # gathered hidden state
            ],
        ),
        # batch tiles are independent -> "parallel" (splits across the 2 TCs on v7x).
        compiler_params=pltpu.CompilerParams(
            dimension_semantics=("parallel",),
            vmem_limit_bytes=vmem_limit,
        ),
    )(tgt, x_tm, wih, b_rnn, whh, w1, b1, w2, b2)

    return out[:B, :C]


def reference_forward(x_in, x_lengths, params, apply_softmax=False):
    """Pure-JAX f32 mirror of the PyTorch forward (dropout as identity)."""
    B, S = x_in.shape
    H = params["rnn_w_hh"].shape[0]
    x_emb = jnp.take(params["emb"], x_in, axis=0)                 # (B, S, E)
    h = jnp.zeros((B, H), jnp.float32)
    hiddens = []
    for t in range(S):
        h = jnp.tanh(x_emb[:, t, :] @ params["rnn_w_ih"].T + params["rnn_b_ih"]
                     + h @ params["rnn_w_hh"].T + params["rnn_b_hh"])
        hiddens.append(h)
    hiddens = jnp.stack(hiddens, axis=1)                          # (B, S, H)
    y = hiddens[jnp.arange(B), x_lengths - 1]                     # column_gather
    y = jax.nn.relu(y @ params["fc1_w"].T + params["fc1_b"])
    y = y @ params["fc2_w"].T + params["fc2_b"]
    if apply_softmax:
        y = jax.nn.softmax(y, axis=1)
    return y


def init_params(key, num_embeddings, embedding_size, rnn_hidden_size, num_classes):
    ks = jax.random.split(key, 9)
    V, E, H, C = num_embeddings, embedding_size, rnn_hidden_size, num_classes

    def unif(k, shape, fan_in):
        bound = 1.0 / jnp.sqrt(jnp.float32(fan_in))
        return jax.random.uniform(k, shape, jnp.float32, -bound, bound)

    emb = jax.random.normal(ks[0], (V, E), jnp.float32)
    emb = emb.at[0].set(0.0)                                      # padding_idx=0
    return {
        "emb": emb,
        "rnn_w_ih": unif(ks[1], (H, E), H),
        "rnn_w_hh": unif(ks[2], (H, H), H),
        "rnn_b_ih": unif(ks[3], (H,), H),
        "rnn_b_hh": unif(ks[4], (H,), H),
        "fc1_w": unif(ks[5], (H, H), H),
        "fc1_b": unif(ks[6], (H,), H),
        "fc2_w": unif(ks[7], (C, H), H),
        "fc2_b": unif(ks[8], (C,), H),
    }


if __name__ == "__main__":
    # Small shapes consistent with the module's forward.
    B, S = 8, 8              # batch, sequence length
    V, E = 64, 32            # num_embeddings, embedding_size
    H, C = 32, 16            # rnn_hidden_size, num_classes

    key = jax.random.PRNGKey(0)
    k_par, k_tok, k_len = jax.random.split(key, 3)

    params = init_params(k_par, V, E, H, C)
    x_in = jax.random.randint(k_tok, (B, S), 1, V, dtype=jnp.int32)
    x_lengths = jax.random.randint(k_len, (B,), 1, S + 1, dtype=jnp.int32)

    out = surname_classifier_forward(x_in, x_lengths, params, apply_softmax=True)
    out = jax.block_until_ready(out)

    ref = reference_forward(x_in, x_lengths, params, apply_softmax=True)
    assert out.shape == (B, C)
    # bf16 MXU operands / bf16 activation stream (f32 accumulation) + approx reciprocal
    # -> relaxed tolerance vs the f32 reference.
    assert jnp.allclose(out, ref, atol=2e-2, rtol=2e-2), "mismatch vs pure-JAX reference"

    print("KERNEL_OK")
</pallas_src>

<mosaic_0001>
module attributes {stable_mosaic.version = 11 : i64} {
  func.func @_classifier_kernel(%arg0: i32, %arg1: memref<8x1xi32, #tpu.memory_space<vmem>>, %arg2: memref<8x8x128xbf16, #tpu.memory_space<vmem>>, %arg3: memref<128x128xbf16, #tpu.memory_space<vmem>>, %arg4: memref<1x128xf32, #tpu.memory_space<vmem>>, %arg5: memref<128x128xbf16, #tpu.memory_space<vmem>>, %arg6: memref<128x128xbf16, #tpu.memory_space<vmem>>, %arg7: memref<1x128xf32, #tpu.memory_space<vmem>>, %arg8: memref<128x128xbf16, #tpu.memory_space<vmem>>, %arg9: memref<1x128xf32, #tpu.memory_space<vmem>>, %arg10: memref<8x128xf32, #tpu.memory_space<vmem>>, %arg11: memref<64x128xf32, #tpu.memory_space<vmem>>, %arg12: memref<8x128xf32, #tpu.memory_space<vmem>>) attributes {dimension_semantics = [#tpu.dimension_semantics<parallel>], iteration_bounds = array<i64: 1>, scalar_prefetch = 0 : i64, scratch_operands = 2 : i64, tpu.core_type = #tpu.core_type<tc>, window_params = [{transform_indices = @transform_0, window_bounds = array<i64: 8, 1>}, {transform_indices = @transform_1, window_bounds = array<i64: 8, 8, 128>}, {pipeline_mode = #tpu.pipeline_mode<synchronous>, transform_indices = @transform_2, window_bounds = array<i64: 128, 128>}, {pipeline_mode = #tpu.pipeline_mode<synchronous>, transform_indices = @transform_3, window_bounds = array<i64: 1, 128>}, {pipeline_mode = #tpu.pipeline_mode<synchronous>, transform_indices = @transform_4, window_bounds = array<i64: 128, 128>}, {pipeline_mode = #tpu.pipeline_mode<synchronous>, transform_indices = @transform_5, window_bounds = array<i64: 128, 128>}, {pipeline_mode = #tpu.pipeline_mode<synchronous>, transform_indices = @transform_6, window_bounds = array<i64: 1, 128>}, {pipeline_mode = #tpu.pipeline_mode<synchronous>, transform_indices = @transform_7, window_bounds = array<i64: 128, 128>}, {pipeline_mode = #tpu.pipeline_mode<synchronous>, transform_indices = @transform_8, window_bounds = array<i64: 1, 128>}, {transform_indices = @transform_9, window_bounds = array<i64: 8, 128>}]} {
    %c0 = arith.constant 0 : index
    %c0_0 = arith.constant 0 : index
    %c0_1 = arith.constant 0 : index
    %0 = vector.load %arg2[%c0, %c0_0, %c0_1] : memref<8x8x128xbf16, #tpu.memory_space<vmem>>, vector<8x8x128xbf16>
    %1 = vector.shape_cast %0 : vector<8x8x128xbf16> to vector<64x128xbf16>
    %c0_2 = arith.constant 0 : index
    %c0_3 = arith.constant 0 : index
    %2 = vector.load %arg3[%c0_2, %c0_3] : memref<128x128xbf16, #tpu.memory_space<vmem>>, vector<128x128xbf16>
    %cst = arith.constant dense<0.000000e+00> : vector<64x128xf32>
    %3 = tpu.matmul %1, %2, %cst {dimension_numbers = #tpu.dot_dimension_numbers<[1], [0], [0], [1], [0, 0, 1, 1], [], []>} : vector<64x128xbf16>, vector<128x128xbf16>, vector<64x128xf32> -> vector<64x128xf32>
    %c0_4 = arith.constant 0 : index
    %c0_5 = arith.constant 0 : index
    %4 = vector.load %arg4[%c0_4, %c0_5] : memref<1x128xf32, #tpu.memory_space<vmem>>, vector<1x128xf32>
    %5 = vector.broadcast %4 : vector<1x128xf32> to vector<64x128xf32>
    %6 = arith.addf %3, %5 : vector<64x128xf32>
    %c0_6 = arith.constant 0 : index
    %c0_7 = arith.constant 0 : index
    %7 = vector.load %arg11[%c0_6, %c0_7] : memref<64x128xf32, #tpu.memory_space<vmem>>, vector<64x128xf32>
    tpu.vector_store %arg11[%c0_6, %c0_7], %6 {strides = array<i32>} : memref<64x128xf32, #tpu.memory_space<vmem>>, vector<64x128xf32>,
    %c0_8 = arith.constant 0 : index
    %c0_9 = arith.constant 0 : index
    %8 = vector.load %arg1[%c0_8, %c0_9] : memref<8x1xi32, #tpu.memory_space<vmem>>, vector<8x1xi32>
    %cst_10 = arith.constant 0.000000e+00 : f32
    %9 = vector.broadcast %cst_10 : f32 to vector<8x128xf32>
    %c0_11 = arith.constant 0 : index
    %c0_12 = arith.constant 0 : index
    %10 = vector.load %arg12[%c0_11, %c0_12] : memref<8x128xf32, #tpu.memory_space<vmem>>, vector<8x128xf32>
    tpu.vector_store %arg12[%c0_11, %c0_12], %9 {strides = array<i32>} : memref<8x128xf32, #tpu.memory_space<vmem>>, vector<8x128xf32>,
    %cst_13 = arith.constant 0.000000e+00 : f32
    %11 = vector.broadcast %cst_13 : f32 to vector<8x128xf32>
    %c0_i32 = arith.constant 0 : i32
    %c8_i32 = arith.constant 8 : i32
    %12 = arith.muli %c0_i32, %c8_i32 : i32
    %13 = tpu.assume_multiple %12, 8 : i32
    %14 = arith.index_cast %13 : i32 to index
    %c0_14 = arith.constant 0 : index
    %15 = vector.load %arg11[%14, %c0_14] : memref<64x128xf32, #tpu.memory_space<vmem>>, vector<8x128xf32>
    %16 = arith.truncf %11 : vector<8x128xf32> to vector<8x128xbf16>
    %c0_15 = arith.constant 0 : index
    %c0_16 = arith.constant 0 : index
    %17 = vector.load %arg5[%c0_15, %c0_16] : memref<128x128xbf16, #tpu.memory_space<vmem>>, vector<128x128xbf16>
    %cst_17 = arith.constant dense<0.000000e+00> : vector<8x128xf32>
    %18 = tpu.matmul %16, %17, %cst_17 {dimension_numbers = #tpu.dot_dimension_numbers<[1], [0], [0], [1], [0, 0, 1, 1], [], []>} : vector<8x128xbf16>, vector<128x128xbf16>, vector<8x128xf32> -> vector<8x128xf32>
    %19 = arith.addf %15, %18 : vector<8x128xf32>
    %20 = math.tanh %19 : vector<8x128xf32>
    %21 = vector.broadcast %c0_i32 : i32 to vector<8x1xi32>
    %22 = arith.cmpi eq, %8, %21 : vector<8x1xi32>
    %23 = vector.shape_cast %22 : vector<8x1xi1> to vector<8x1xi1>
    %24 = vector.broadcast %23 : vector<8x1xi1> to vector<8x128xi1>
    %c0_18 = arith.constant 0 : index
    %c0_19 = arith.constant 0 : index
    %25 = vector.load %arg12[%c0_18, %c0_19] : memref<8x128xf32, #tpu.memory_space<vmem>>, vector<8x128xf32>
    tpu.vector_store %arg12[%c0_18, %c0_19], %20 masked %24 {strides = array<i32>} : memref<8x128xf32, #tpu.memory_space<vmem>>, vector<8x128xf32>, vector<8x128xi1>
    %c1_i32 = arith.constant 1 : i32
    %c8_i32_20 = arith.constant 8 : i32
    %26 = arith.muli %c1_i32, %c8_i32_20 : i32
    %27 = tpu.assume_multiple %26, 8 : i32
    %28 = arith.index_cast %27 : i32 to index
    %c0_21 = arith.constant 0 : index
    %29 = vector.load %arg11[%28, %c0_21] : memref<64x128xf32, #tpu.memory_space<vmem>>, vector<8x128xf32>
    %30 = arith.truncf %20 : vector<8x128xf32> to vector<8x128xbf16>
    %c0_22 = arith.constant 0 : index
    %c0_23 = arith.constant 0 : index
    %31 = vector.load %arg5[%c0_22, %c0_23] : memref<128x128xbf16, #tpu.memory_space<vmem>>, vector<128x128xbf16>
    %cst_24 = arith.constant dense<0.000000e+00> : vector<8x128xf32>
    %32 = tpu.matmul %30, %31, %cst_24 {dimension_numbers = #tpu.dot_dimension_numbers<[1], [0], [0], [1], [0, 0, 1, 1], [], []>} : vector<8x128xbf16>, vector<128x128xbf16>, vector<8x128xf32> -> vector<8x128xf32>
    %33 = arith.addf %29, %32 : vector<8x128xf32>
    %34 = math.tanh %33 : vector<8x128xf32>
    %35 = vector.broadcast %c1_i32 : i32 to vector<8x1xi32>
    %36 = arith.cmpi eq, %8, %35 : vector<8x1xi32>
    %37 = vector.shape_cast %36 : vector<8x1xi1> to vector<8x1xi1>
    %38 = vector.broadcast %37 : vector<8x1xi1> to vector<8x128xi1>
    %c0_25 = arith.constant 0 : index
    %c0_26 = arith.constant 0 : index
    %39 = vector.load %arg12[%c0_25, %c0_26] : memref<8x128xf32, #tpu.memory_space<vmem>>, vector<8x128xf32>
    tpu.vector_store %arg12[%c0_25, %c0_26], %34 masked %38 {strides = array<i32>} : memref<8x128xf32, #tpu.memory_space<vmem>>, vector<8x128xf32>, vector<8x128xi1>
    %c2_i32 = arith.constant 2 : i32
    %c8_i32_27 = arith.constant 8 : i32
    %40 = arith.muli %c2_i32, %c8_i32_27 : i32
    %41 = tpu.assume_multiple %40, 8 : i32
    %42 = arith.index_cast %41 : i32 to index
    %c0_28 = arith.constant 0 : index
    %43 = vector.load %arg11[%42, %c0_28] : memref<64x128xf32, #tpu.memory_space<vmem>>, vector<8x128xf32>
    %44 = arith.truncf %34 : vector<8x128xf32> to vector<8x128xbf16>
    %c0_29 = arith.constant 0 : index
    %c0_30 = arith.constant 0 : index
    %45 = vector.load %arg5[%c0_29, %c0_30] : memref<128x128xbf16, #tpu.memory_space<vmem>>, vector<128x128xbf16>
    %cst_31 = arith.constant dense<0.000000e+00> : vector<8x128xf32>
    %46 = tpu.matmul %44, %45, %cst_31 {dimension_numbers = #tpu.dot_dimension_numbers<[1], [0], [0], [1], [0, 0, 1, 1], [], []>} : vector<8x128xbf16>, vector<128x128xbf16>, vector<8x128xf32> -> vector<8x128xf32>
    %47 = arith.addf %43, %46 : vector<8x128xf32>
    %48 = math.tanh %47 : vector<8x128xf32>
    %49 = vector.broadcast %c2_i32 : i32 to vector<8x1xi32>
    %50 = arith.cmpi eq, %8, %49 : vector<8x1xi32>
    %51 = vector.shape_cast %50 : vector<8x1xi1> to vector<8x1xi1>
    %52 = vector.broadcast %51 : vector<8x1xi1> to vector<8x128xi1>
    %c0_32 = arith.constant 0 : index
    %c0_33 = arith.constant 0 : index
    %53 = vector.load %arg12[%c0_32, %c0_33] : memref<8x128xf32, #tpu.memory_space<vmem>>, vector<8x128xf32>
    tpu.vector_store %arg12[%c0_32, %c0_33], %48 masked %52 {strides = array<i32>} : memref<8x128xf32, #tpu.memory_space<vmem>>, vector<8x128xf32>, vector<8x128xi1>
    %c3_i32 = arith.constant 3 : i32
    %c8_i32_34 = arith.constant 8 : i32
    %54 = arith.muli %c3_i32, %c8_i32_34 : i32
    %55 = tpu.assume_multiple %54, 8 : i32
    %56 = arith.index_cast %55 : i32 to index
    %c0_35 = arith.constant 0 : index
    %57 = vector.load %arg11[%56, %c0_35] : memref<64x128xf32, #tpu.memory_space<vmem>>, vector<8x128xf32>
    %58 = arith.truncf %48 : vector<8x128xf32> to vector<8x128xbf16>
    %c0_36 = arith.constant 0 : index
    %c0_37 = arith.constant 0 : index
    %59 = vector.load %arg5[%c0_36, %c0_37] : memref<128x128xbf16, #tpu.memory_space<vmem>>, vector<128x128xbf16>
    %cst_38 = arith.constant dense<0.000000e+00> : vector<8x128xf32>
    %60 = tpu.matmul %58, %59, %cst_38 {dimension_numbers = #tpu.dot_dimension_numbers<[1], [0], [0], [1], [0, 0, 1, 1], [], []>} : vector<8x128xbf16>, vector<128x128xbf16>, vector<8x128xf32> -> vector<8x128xf32>
    %61 = arith.addf %57, %60 : vector<8x128xf32>
    %62 = math.tanh %61 : vector<8x128xf32>
    %63 = vector.broadcast %c3_i32 : i32 to vector<8x1xi32>
    %64 = arith.cmpi eq, %8, %63 : vector<8x1xi32>
    %65 = vector.shape_cast %64 : vector<8x1xi1> to vector<8x1xi1>
    %66 = vector.broadcast %65 : vector<8x1xi1> to vector<8x128xi1>
    %c0_39 = arith.constant 0 : index
    %c0_40 = arith.constant 0 : index
    %67 = vector.load %arg12[%c0_39, %c0_40] : memref<8x128xf32, #tpu.memory_space<vmem>>, vector<8x128xf32>
    tpu.vector_store %arg12[%c0_39, %c0_40], %62 masked %66 {strides = array<i32>} : memref<8x128xf32, #tpu.memory_space<vmem>>, vector<8x128xf32>, vector<8x128xi1>
    %c4_i32 = arith.constant 4 : i32
    %c8_i32_41 = arith.constant 8 : i32
    %68 = arith.muli %c4_i32, %c8_i32_41 : i32
    %69 = tpu.assume_multiple %68, 8 : i32
    %70 = arith.index_cast %69 : i32 to index
    %c0_42 = arith.constant 0 : index
    %71 = vector.load %arg11[%70, %c0_42] : memref<64x128xf32, #tpu.memory_space<vmem>>, vector<8x128xf32>
    %72 = arith.truncf %62 : vector<8x128xf32> to vector<8x128xbf16>
    %c0_43 = arith.constant 0 : index
    %c0_44 = arith.constant 0 : index
    %73 = vector.load %arg5[%c0_43, %c0_44] : memref<128x128xbf16, #tpu.memory_space<vmem>>, vector<128x128xbf16>
    %cst_45 = arith.constant dense<0.000000e+00> : vector<8x128xf32>
    %74 = tpu.matmul %72, %73, %cst_45 {dimension_numbers = #tpu.dot_dimension_numbers<[1], [0], [0], [1], [0, 0, 1, 1], [], []>} : vector<8x128xbf16>, vector<128x128xbf16>, vector<8x128xf32> -> vector<8x128xf32>
    %75 = arith.addf %71, %74 : vector<8x128xf32>
    %76 = math.tanh %75 : vector<8x128xf32>
    %77 = vector.broadcast %c4_i32 : i32 to vector<8x1xi32>
    %78 = arith.cmpi eq, %8, %77 : vector<8x1xi32>
    %79 = vector.shape_cast %78 : vector<8x1xi1> to vector<8x1xi1>
    %80 = vector.broadcast %79 : vector<8x1xi1> to vector<8x128xi1>
    %c0_46 = arith.constant 0 : index
    %c0_47 = arith.constant 0 : index
    %81 = vector.load %arg12[%c0_46, %c0_47] : memref<8x128xf32, #tpu.memory_space<vmem>>, vector<8x128xf32>
    tpu.vector_store %arg12[%c0_46, %c0_47], %76 masked %80 {strides = array<i32>} : memref<8x128xf32, #tpu.memory_space<vmem>>, vector<8x128xf32>, vector<8x128xi1>
    %c5_i32 = arith.constant 5 : i32
    %c8_i32_48 = arith.constant 8 : i32
    %82 = arith.muli %c5_i32, %c8_i32_48 : i32
    %83 = tpu.assume_multiple %82, 8 : i32
    %84 = arith.index_cast %83 : i32 to index
    %c0_49 = arith.constant 0 : index
    %85 = vector.load %arg11[%84, %c0_49] : memref<64x128xf32, #tpu.memory_space<vmem>>, vector<8x128xf32>
    %86 = arith.truncf %76 : vector<8x128xf32> to vector<8x128xbf16>
    %c0_50 = arith.constant 0 : index
    %c0_51 = arith.constant 0 : index
    %87 = vector.load %arg5[%c0_50, %c0_51] : memref<128x128xbf16, #tpu.memory_space<vmem>>, vector<128x128xbf16>
    %cst_52 = arith.constant dense<0.000000e+00> : vector<8x128xf32>
    %88 = tpu.matmul %86, %87, %cst_52 {dimension_numbers = #tpu.dot_dimension_numbers<[1], [0], [0], [1], [0, 0, 1, 1], [], []>} : vector<8x128xbf16>, vector<128x128xbf16>, vector<8x128xf32> -> vector<8x128xf32>
    %89 = arith.addf %85, %88 : vector<8x128xf32>
    %90 = math.tanh %89 : vector<8x128xf32>
    %91 = vector.broadcast %c5_i32 : i32 to vector<8x1xi32>
    %92 = arith.cmpi eq, %8, %91 : vector<8x1xi32>
    %93 = vector.shape_cast %92 : vector<8x1xi1> to vector<8x1xi1>
    %94 = vector.broadcast %93 : vector<8x1xi1> to vector<8x128xi1>
    %c0_53 = arith.constant 0 : index
    %c0_54 = arith.constant 0 : index
    %95 = vector.load %arg12[%c0_53, %c0_54] : memref<8x128xf32, #tpu.memory_space<vmem>>, vector<8x128xf32>
    tpu.vector_store %arg12[%c0_53, %c0_54], %90 masked %94 {strides = array<i32>} : memref<8x128xf32, #tpu.memory_space<vmem>>, vector<8x128xf32>, vector<8x128xi1>
    %c6_i32 = arith.constant 6 : i32
    %c8_i32_55 = arith.constant 8 : i32
    %96 = arith.muli %c6_i32, %c8_i32_55 : i32
    %97 = tpu.assume_multiple %96, 8 : i32
    %98 = arith.index_cast %97 : i32 to index
    %c0_56 = arith.constant 0 : index
    %99 = vector.load %arg11[%98, %c0_56] : memref<64x128xf32, #tpu.memory_space<vmem>>, vector<8x128xf32>
    %100 = arith.truncf %90 : vector<8x128xf32> to vector<8x128xbf16>
    %c0_57 = arith.constant 0 : index
    %c0_58 = arith.constant 0 : index
    %101 = vector.load %arg5[%c0_57, %c0_58] : memref<128x128xbf16, #tpu.memory_space<vmem>>, vector<128x128xbf16>
    %cst_59 = arith.constant dense<0.000000e+00> : vector<8x128xf32>
    %102 = tpu.matmul %100, %101, %cst_59 {dimension_numbers = #tpu.dot_dimension_numbers<[1], [0], [0], [1], [0, 0, 1, 1], [], []>} : vector<8x128xbf16>, vector<128x128xbf16>, vector<8x128xf32> -> vector<8x128xf32>
    %103 = arith.addf %99, %102 : vector<8x128xf32>
    %104 = math.tanh %103 : vector<8x128xf32>
    %105 = vector.broadcast %c6_i32 : i32 to vector<8x1xi32>
    %106 = arith.cmpi eq, %8, %105 : vector<8x1xi32>
    %107 = vector.shape_cast %106 : vector<8x1xi1> to vector<8x1xi1>
    %108 = vector.broadcast %107 : vector<8x1xi1> to vector<8x128xi1>
    %c0_60 = arith.constant 0 : index
    %c0_61 = arith.constant 0 : index
    %109 = vector.load %arg12[%c0_60, %c0_61] : memref<8x128xf32, #tpu.memory_space<vmem>>, vector<8x128xf32>
    tpu.vector_store %arg12[%c0_60, %c0_61], %104 masked %108 {strides = array<i32>} : memref<8x128xf32, #tpu.memory_space<vmem>>, vector<8x128xf32>, vector<8x128xi1>
    %c7_i32 = arith.constant 7 : i32
    %c8_i32_62 = arith.constant 8 : i32
    %110 = arith.muli %c7_i32, %c8_i32_62 : i32
    %111 = tpu.assume_multiple %110, 8 : i32
    %112 = arith.index_cast %111 : i32 to index
    %c0_63 = arith.constant 0 : index
    %113 = vector.load %arg11[%112, %c0_63] : memref<64x128xf32, #tpu.memory_space<vmem>>, vector<8x128xf32>
    %114 = arith.truncf %104 : vector<8x128xf32> to vector<8x128xbf16>
    %c0_64 = arith.constant 0 : index
    %c0_65 = arith.constant 0 : index
    %115 = vector.load %arg5[%c0_64, %c0_65] : memref<128x128xbf16, #tpu.memory_space<vmem>>, vector<128x128xbf16>
    %cst_66 = arith.constant dense<0.000000e+00> : vector<8x128xf32>
    %116 = tpu.matmul %114, %115, %cst_66 {dimension_numbers = #tpu.dot_dimension_numbers<[1], [0], [0], [1], [0, 0, 1, 1], [], []>} : vector<8x128xbf16>, vector<128x128xbf16>, vector<8x128xf32> -> vector<8x128xf32>
    %117 = arith.addf %113, %116 : vector<8x128xf32>
    %118 = math.tanh %117 : vector<8x128xf32>
    %119 = vector.broadcast %c7_i32 : i32 to vector<8x1xi32>
    %120 = arith.cmpi eq, %8, %119 : vector<8x1xi32>
    %121 = vector.shape_cast %120 : vector<8x1xi1> to vector<8x1xi1>
    %122 = vector.broadcast %121 : vector<8x1xi1> to vector<8x128xi1>
    %c0_67 = arith.constant 0 : index
    %c0_68 = arith.constant 0 : index
    %123 = vector.load %arg12[%c0_67, %c0_68] : memref<8x128xf32, #tpu.memory_space<vmem>>, vector<8x128xf32>
    tpu.vector_store %arg12[%c0_67, %c0_68], %118 masked %122 {strides = array<i32>} : memref<8x128xf32, #tpu.memory_space<vmem>>, vector<8x128xf32>, vector<8x128xi1>
    %c8_i32_69 = arith.constant 8 : i32
    %c0_70 = arith.constant 0 : index
    %c0_71 = arith.constant 0 : index
    %124 = vector.load %arg12[%c0_70, %c0_71] : memref<8x128xf32, #tpu.memory_space<vmem>>, vector<8x128xf32>
    %125 = arith.truncf %124 : vector<8x128xf32> to vector<8x128xbf16>
    %c0_72 = arith.constant 0 : index
    %c0_73 = arith.constant 0 : index
    %126 = vector.load %arg6[%c0_72, %c0_73] : memref<128x128xbf16, #tpu.memory_space<vmem>>, vector<128x128xbf16>
    %cst_74 = arith.constant dense<0.000000e+00> : vector<8x128xf32>
    %127 = tpu.matmul %125, %126, %cst_74 {dimension_numbers = #tpu.dot_dimension_numbers<[1], [0], [0], [1], [0, 0, 1, 1], [], []>} : vector<8x128xbf16>, vector<128x128xbf16>, vector<8x128xf32> -> vector<8x128xf32>
    %c0_75 = arith.constant 0 : index
    %c0_76 = arith.constant 0 : index
    %128 = vector.load %arg7[%c0_75, %c0_76] : memref<1x128xf32, #tpu.memory_space<vmem>>, vector<1x128xf32>
    %129 = vector.broadcast %128 : vector<1x128xf32> to vector<8x128xf32>
    %130 = arith.addf %127, %129 : vector<8x128xf32>
    %cst_77 = arith.constant 0.000000e+00 : f32
    %131 = vector.broadcast %cst_77 : f32 to vector<8x128xf32>
    %132 = arith.maximumf %130, %131 : vector<8x128xf32>
    %133 = arith.truncf %132 : vector<8x128xf32> to vector<8x128xbf16>
    %c0_78 = arith.constant 0 : index
    %c0_79 = arith.constant 0 : index
    %134 = vector.load %arg8[%c0_78, %c0_79] : memref<128x128xbf16, #tpu.memory_space<vmem>>, vector<128x128xbf16>
    %cst_80 = arith.constant dense<0.000000e+00> : vector<8x128xf32>
    %135 = tpu.matmul %133, %134, %cst_80 {dimension_numbers = #tpu.dot_dimension_numbers<[1], [0], [0], [1], [0, 0, 1, 1], [], []>} : vector<8x128xbf16>, vector<128x128xbf16>, vector<8x128xf32> -> vector<8x128xf32>
    %c0_81 = arith.constant 0 : index
    %c0_82 = arith.constant 0 : index
    %136 = vector.load %arg9[%c0_81, %c0_82] : memref<1x128xf32, #tpu.memory_space<vmem>>, vector<1x128xf32>
    %137 = vector.broadcast %136 : vector<1x128xf32> to vector<8x128xf32>
    %138 = arith.addf %135, %137 : vector<8x128xf32>
    %cst_83 = arith.constant dense<0xFF800000> : vector<8xf32>
    %139 = vector.multi_reduction <maximumf>, %138, %cst_83 [1] : vector<8x128xf32> to vector<8xf32>
    %140 = vector.shape_cast %139 : vector<8xf32> to vector<8x1xf32>
    %141 = vector.broadcast %140 : vector<8x1xf32> to vector<8x128xf32>
    %142 = arith.subf %138, %141 : vector<8x128xf32>
    %143 = math.exp %142 : vector<8x128xf32>
    %cst_84 = arith.constant dense<0.000000e+00> : vector<8xf32>
    %144 = vector.multi_reduction <add>, %143, %cst_84 [1] : vector<8x128xf32> to vector<8xf32>
    %145 = vector.shape_cast %144 : vector<8xf32> to vector<8x1xf32>
    %146 = tpu.reciprocal %145 {approx = true} : vector<8x1xf32> -> vector<8x1xf32>
    %147 = vector.broadcast %146 : vector<8x1xf32> to vector<8x128xf32>
    %148 = arith.mulf %143, %147 : vector<8x128xf32>
    %c0_85 = arith.constant 0 : index
    %c0_86 = arith.constant 0 : index
    %149 = vector.load %arg10[%c0_85, %c0_86] : memref<8x128xf32, #tpu.memory_space<vmem>>, vector<8x128xf32>
    tpu.vector_store %arg10[%c0_85, %c0_86], %148 {strides = array<i32>} : memref<8x128xf32, #tpu.memory_space<vmem>>, vector<8x128xf32>,
    return
  }
  func.func @transform_0(%arg0: i32) -> (i32, i32) {
    %c0_i32 = arith.constant 0 : i32
    %c0_i32_0 = arith.constant 0 : i32
    return %arg0, %c0_i32 : i32, i32
  }
  func.func @transform_1(%arg0: i32) -> (i32, i32, i32) {
    %c0_i32 = arith.constant 0 : i32
    %c0_i32_0 = arith.constant 0 : i32
    %c0_i32_1 = arith.constant 0 : i32
    return %c0_i32, %arg0, %c0_i32_0 : i32, i32, i32
  }
  func.func @transform_2(%arg0: i32) -> (i32, i32) {
    %c0_i32 = arith.constant 0 : i32
    %c0_i32_0 = arith.constant 0 : i32
    %c0_i32_1 = arith.constant 0 : i32
    return %c0_i32, %c0_i32_0 : i32, i32
  }
  func.func @transform_3(%arg0: i32) -> (i32, i32) {
    %c0_i32 = arith.constant 0 : i32
    %c0_i32_0 = arith.constant 0 : i32
    %c0_i32_1 = arith.constant 0 : i32
    return %c0_i32, %c0_i32_0 : i32, i32
  }
  func.func @transform_4(%arg0: i32) -> (i32, i32) {
    %c0_i32 = arith.constant 0 : i32
    %c0_i32_0 = arith.constant 0 : i32
    %c0_i32_1 = arith.constant 0 : i32
    return %c0_i32, %c0_i32_0 : i32, i32
  }
  func.func @transform_5(%arg0: i32) -> (i32, i32) {
    %c0_i32 = arith.constant 0 : i32
    %c0_i32_0 = arith.constant 0 : i32
    %c0_i32_1 = arith.constant 0 : i32
    return %c0_i32, %c0_i32_0 : i32, i32
  }
  func.func @transform_6(%arg0: i32) -> (i32, i32) {
    %c0_i32 = arith.constant 0 : i32
    %c0_i32_0 = arith.constant 0 : i32
    %c0_i32_1 = arith.constant 0 : i32
    return %c0_i32, %c0_i32_0 : i32, i32
  }
  func.func @transform_7(%arg0: i32) -> (i32, i32) {
    %c0_i32 = arith.constant 0 : i32
    %c0_i32_0 = arith.constant 0 : i32
    %c0_i32_1 = arith.constant 0 : i32
    return %c0_i32, %c0_i32_0 : i32, i32
  }
  func.func @transform_8(%arg0: i32) -> (i32, i32) {
    %c0_i32 = arith.constant 0 : i32
    %c0_i32_0 = arith.constant 0 : i32
    %c0_i32_1 = arith.constant 0 : i32
    return %c0_i32, %c0_i32_0 : i32, i32
  }
  func.func @transform_9(%arg0: i32) -> (i32, i32) {
    %c0_i32 = arith.constant 0 : i32
    %c0_i32_0 = arith.constant 0 : i32
    return %arg0, %c0_i32 : i32, i32
  }
}

</mosaic_0001>

<bundles_post_ra>
// kernel: tpu_custom_call.1
= control target key start
LH: loop header
LB: loop body
LE: loop exit
PB: predicated region body
PF: predicated region fallthrough
CT: control target
= control target key end

     0   :  { %14 = vsyncpa [#allocation5], 0  ;;  %s1926_s0 = inlined_call_operand.vmem [shape: s32[8,1], index: 0, kind: input, shape index: {}]   ;;  %s1927_s1 = inlined_call_operand.hbm [shape: bf16[8,8,128], index: 1, kind: input, shape index: {}]   ;;  %s1928_s2 = inlined_call_operand.hbm [shape: bf16[128,128], index: 2, kind: input, shape index: {}]   ;;  %s1929_s3 = inlined_call_operand.vmem [shape: f32[1,128], index: 3, kind: input, shape index: {}]   ;;  %s1930_s4 = inlined_call_operand.hbm [shape: bf16[128,128], index: 4, kind: input, shape index: {}]   ;;  %s1931_s5 = inlined_call_operand.hbm [shape: bf16[128,128], index: 5, kind: input, shape index: {}]   ;;  %s1932_s6 = inlined_call_operand.vmem [shape: f32[1,128], index: 6, kind: input, shape index: {}]   ;;  %s1933_s7 = inlined_call_operand.hbm [shape: bf16[128,128], index: 7, kind: input, shape index: {}]   ;;  %s1934_s8 = inlined_call_operand.vmem [shape: f32[1,128], index: 8, kind: input, shape index: {}]   ;;  %s1935_s9 = inlined_call_operand.hbm [shape: f32[8,128], index: 9, kind: output, shape index: {}]  }
   0x1   :  { %15 = vsyncpa [#allocation8], 0 }
   0x2   :  { %16 = vsyncpa [#allocation11], 0 }
   0x3   :  { %17 = vsyncpa [#allocation6], 0  ;;  %s37_s11 = sshll.u32 %s1928_s2, 4  ;;  %s1804_s12 = smov [#allocation7]   ;;  %s38_s11 = int_to_ptr.hbm [resolvable:$true] %s37_s11 }
   0x4   :  { %s39_s13 = sshll.u32 %s1804_s12, 4  ;;  %s65_s16 = sshll.u32 %s1931_s5, 4  ;;  %s40_s13 = int_to_ptr.vmem [resolvable:$true] %s39_s13  ;;  %s66_s16 = int_to_ptr.hbm [resolvable:$true] %s65_s16 }
   0x5   :  { %s1805_s17 = smov 64   ;;  %s1806_s18 = smov 4  }
   0x6   :  { %45 = dma.hbm_to_vmem [thread:$0]  %s38_s11, 1024, %s40_s13, [#allocation8], %s1805_s17, %s1805_s17, %s1806_s18  }
   0x7   :  { %s1807_s19 = smov [#allocation10]   ;;  %s24_s23 = sshll.u32 %s1927_s1, 4  ;;  %s25_s23 = int_to_ptr.hbm [resolvable:$true] %s24_s23 }
   0x8   :  { %s67_s20 = sshll.u32 %s1807_s19, 4  ;;  %s52_s25 = sshll.u32 %s1930_s4, 4  ;;  %s68_s20 = int_to_ptr.vmem [resolvable:$true] %s67_s20  ;;  %s53_s25 = int_to_ptr.hbm [resolvable:$true] %s52_s25 }
   0x9   :  { %73 = dma.hbm_to_vmem [thread:$0]  %s66_s16, 1024, %s68_s20, [#allocation11], %s1805_s17, %s1805_s17, %s1806_s18  }
   0xa   :  { %s1808_s26 = smov [#allocation4]   ;;  %s1809_s5 = smov [#allocation9]  }
   0xb   :  { %s26_s27 = sshll.u32 %s1808_s26, 4  ;;  %s54_s28 = sshll.u32 %s1809_s5, 4  ;;  %s27_s27 = int_to_ptr.vmem [resolvable:$true] %s26_s27  ;;  %s55_s28 = int_to_ptr.vmem [resolvable:$true] %s54_s28 }
   0xc   :  { %32 = dma.hbm_to_vmem [thread:$0]  %s25_s23, 512, %s27_s27, [#allocation5], %s1805_s17, %s1805_s17, %s1806_s18  }
   0xd   :  { %s80_s10 = sshll.u32 %s1933_s7, 4  ;;  %s1810_s1 = smov [#allocation12]   ;;  %s81_s10 = int_to_ptr.hbm [resolvable:$true] %s80_s10 }
   0xe   :  { %60 = dma.hbm_to_vmem [thread:$0]  %s53_s25, 1024, %s55_s28, [#allocation8], %s1805_s17, %s1805_s17, %s1806_s18  }
   0xf   :  { %s82_s11 = sshll.u32 %s1810_s1, 4  ;;  %s83_s11 = int_to_ptr.vmem [resolvable:$true] %s82_s11 }
  0x10   :  { %88 = dma.hbm_to_vmem [thread:$0]  %s81_s10, 1024, %s83_s11, [#allocation11], %s1805_s17, %s1805_s17, %s1806_s18  }
  0x11   :  { %1796 = dma.done.wait [#allocation5], 512  }
  0x12   :  { %1797 = vsyncadd [#allocation5], 4294966784 }
  0x13   :  { %1798 = dma.done.wait [#allocation8], 2048  }
  0x14   :  { %1799 = vsyncadd [#allocation8], 4294965248 }
  0x15   :  { %1800 = dma.done.wait [#allocation11], 2048  }
  0x16   :  { %1801 = vsyncadd [#allocation11], 4294965248  ;;  %v1535_v0 = vld [vmem:[#allocation7 + $0x38] sm:$0xff]  ;;  %v1811_v2 = vmov 0   ;;  %v1534_v3 = vld [vmem:[#allocation7 + $0x30] sm:$0xff]  ;;  %v1812_v28 = vmov 0.0  }
  0x17   :  { %v1543_v1 = vld [vmem:[#allocation9 + $0x38] sm:$0xff]  ;;  %1626 = vset.pattern.permute.xlu0 %v1811_v2  ;;  %1627 = vset.pattern.permute.xlu1 %v1811_v2  ;;  %v1542_v4 = vld [vmem:[#allocation9 + $0x30] sm:$0xff]  ;;  %v1533_v6 = vld [vmem:[#allocation7 + $0x28] sm:$0xff]  ;;  %250 = vst [vmem:[#allocation3] sm:$0xff] %v1812_v28  ;;  %s1144_s19 = sshll.u32 %s1935_s9, 4  ;;  %s1145_s19 = int_to_ptr.hbm [resolvable:$true] %s1144_s19 }
  0x18   :  { %212 = vmatpush.bf16.msra.mxu0 %v1535_v0  ;;  %316 = vmatpush.bf16.msra.mxu1 %v1543_v1  ;;  %v1885_v5 = vld [vmem:[%s1926_s0] sm:$0xff]  ;;  %v1541_v7 = vld [vmem:[#allocation9 + $0x28] sm:$0xff]  ;;  %v1550_v10 = vld [vmem:[#allocation9 + $0x30] sm:$0xff] }
  0x19   :  { %1628 = vset.pattern.permute.xlu2 %v1811_v2  ;;  %vm331_vm0 = vcmp.eq.s32.totalorder %v1885_v5, 0  ;;  %v1551_v8 = vld [vmem:[#allocation9 + $0x38] sm:$0xff]  ;;  %v1532_v11 = vld [vmem:[#allocation7 + $0x20] sm:$0xff]  ;;  %v1549_v13 = vld [vmem:[#allocation9 + $0x28] sm:$0xff]  ;;  %vm420_vm1 = vcmp.eq.s32.totalorder %v1885_v5, 1  ;;  %vm509_vm3 = vcmp.eq.s32.totalorder %v1885_v5, 2 }
  0x1a   :  { %v332_v9 = vsel %vm331_vm0, 1, %v1811_v2  ;;  %405 = vmatpush.bf16.msra.mxu2 %v1551_v8  ;;  %v1540_v12 = vld [vmem:[#allocation9 + $0x20] sm:$0xff]  ;;  %v1531_v14 = vld [vmem:[#allocation7 + $0x18] sm:$0xff]  ;;  %v1530_v17 = vld [vmem:[#allocation7 + $0x10] sm:$0xff]  ;;  %v421_v30 = vsel %vm420_vm1, 1, %v1811_v2  ;;  %v510_v49 = vsel %vm509_vm3, 1, %v1811_v2 }
  0x1b   :  { %334 = vperm.xlu0 %1626, %v332_v9   ;;  %v1539_v15 = vld [vmem:[#allocation9 + $0x18] sm:$0xff]  ;;  %v1548_v16 = vld [vmem:[#allocation9 + $0x20] sm:$0xff]  ;;  %v1538_v18 = vld [vmem:[#allocation9 + $0x10] sm:$0xff]  ;;  %512 = vperm.xlu1 %1627, %v510_v49   ;;  %vm598_vm5 = vcmp.eq.s32.totalorder %v1885_v5, 3  ;;  %vm687_vm7 = vcmp.eq.s32.totalorder %v1885_v5, 4  ;;  %vm776_vm9 = vcmp.eq.s32.totalorder %v1885_v5, 5 }
  0x1c   :  { %213 = vmatpush.bf16.msra.mxu0 %v1534_v3  ;;  %317 = vmatpush.bf16.msra.mxu1 %v1542_v4  ;;  %v1547_v19 = vld [vmem:[#allocation9 + $0x18] sm:$0xff]  ;;  %v1529_v20 = vld [vmem:[#allocation7 + $0x8] sm:$0xff]  ;;  %v1528_v22 = vld [vmem:[#allocation7] sm:$0xff]  ;;  %v599_v3 = vsel %vm598_vm5, 1, %v1811_v2  ;;  %vm865_vm11 = vcmp.eq.s32.totalorder %v1885_v5, 6  ;;  %vm954_vm13 = vcmp.eq.s32.totalorder %v1885_v5, 7 }
  0x1d   :  { %v1537_v21 = vld [vmem:[#allocation9 + $0x8] sm:$0xff]  ;;  %v1536_v23 = vld [vmem:[#allocation9] sm:$0xff]  ;;  %v1546_v25 = vld [vmem:[#allocation9 + $0x10] sm:$0xff] }
  0x1e   :  { %406 = vmatpush.bf16.msra.mxu2 %v1550_v10  ;;  %v1524_v24 = vld [vmem:[#allocation4] sm:$0xff]  ;;  %v1545_v26 = vld [vmem:[#allocation9 + $0x8] sm:$0xff]  ;;  %v1559_v29 = vld [vmem:[#allocation9 + $0x38] sm:$0xff] }
  0x1f   :  { %v1544_v27 = vld [vmem:[#allocation9] sm:$0xff]  ;;  %494 = vmatpush.bf16.msra.mxu3 %v1559_v29  ;;  %v1558_v31 = vld [vmem:[#allocation9 + $0x30] sm:$0xff]  ;;  %v1557_v32 = vld [vmem:[#allocation9 + $0x28] sm:$0xff] }
  0x20   :  { %214 = vmatpush.bf16.msra.mxu0 %v1533_v6  ;;  %318 = vmatpush.bf16.msra.mxu1 %v1541_v7  ;;  %v1556_v33 = vld [vmem:[#allocation9 + $0x20] sm:$0xff]  ;;  %v1555_v34 = vld [vmem:[#allocation9 + $0x18] sm:$0xff]  ;;  %v1554_v44 = vld [vmem:[#allocation9 + $0x10] sm:$0xff] }
  0x21   :  { %v1895_v35 = vld [vmem:[%s1929_s3] ss:$0 sm:$0xff]  ;;  %v1553_v45 = vld [vmem:[#allocation9 + $0x8] sm:$0xff]  ;;  %v1552_v47 = vld [vmem:[#allocation9] sm:$0xff] }
  0x22   :  { %407 = vmatpush.bf16.msra.mxu2 %v1549_v13  ;;  %v1525_v46 = vld [vmem:[#allocation4 + $0x8] sm:$0xff]  ;;  %v1567_v48 = vld [vmem:[#allocation9 + $0x38] sm:$0xff]  ;;  %v1566_v50 = vld [vmem:[#allocation9 + $0x30] sm:$0xff] }
  0x23   :  { %423 = vperm.xlu0 %1626, %v421_v30   ;;  %495 = vmatpush.bf16.msra.mxu3 %v1558_v31  ;;  %v1565_v51 = vld [vmem:[#allocation9 + $0x28] sm:$0xff]  ;;  %v1564_v60 = vld [vmem:[#allocation9 + $0x20] sm:$0xff]  ;;  %v1563_v61 = vld [vmem:[#allocation9 + $0x18] sm:$0xff] }
  0x24   :  { %215 = vmatpush.bf16.msra.mxu0 %v1532_v11  ;;  %319 = vmatpush.bf16.msra.mxu1 %v1540_v12  ;;  %v1562_v62 = vld [vmem:[#allocation9 + $0x10] sm:$0xff]  ;;  %v1561_v63 = vld [vmem:[#allocation9 + $0x8] sm:$0xff]  ;;  %v1560_v0 = vld [vmem:[#allocation9] sm:$0xff] }
  0x25   :  { %v1575_v1 = vld [vmem:[#allocation9 + $0x38] sm:$0xff]  ;;  %601 = vperm.xlu1 %1627, %v599_v3   ;;  %v1574_v4 = vld [vmem:[#allocation9 + $0x30] sm:$0xff]  ;;  %v1573_v6 = vld [vmem:[#allocation9 + $0x28] sm:$0xff] }
  0x26   :  { %408 = vmatpush.bf16.msra.mxu2 %v1548_v16  ;;  %v1572_v7 = vld [vmem:[#allocation9 + $0x20] sm:$0xff]  ;;  %v1571_v8 = vld [vmem:[#allocation9 + $0x18] sm:$0xff]  ;;  %v1606_v5 = vld [vmem:[#allocation10 + $0x30] sm:$0xff] }
  0x27   :  { %496 = vmatpush.bf16.msra.mxu3 %v1557_v32 }
  0x28   :  { %216 = vmatpush.bf16.msra.mxu0 %v1531_v14  ;;  %320 = vmatpush.bf16.msra.mxu1 %v1539_v15 }
  0x2a   :  { %409 = vmatpush.bf16.msra.mxu2 %v1547_v19  ;;  %v1526_v19 = vld [vmem:[#allocation4 + $0x10] sm:$0xff] }
  0x2b   :  { %497 = vmatpush.bf16.msra.mxu3 %v1556_v33  ;;  %v1580_v33 = vld [vmem:[#allocation9 + $0x20] sm:$0xff] }
  0x2c   :  { %217 = vmatpush.bf16.msra.mxu0 %v1530_v17  ;;  %321 = vmatpush.bf16.msra.mxu1 %v1538_v18  ;;  %v1570_v17 = vld [vmem:[#allocation9 + $0x10] sm:$0xff]  ;;  %v1569_v18 = vld [vmem:[#allocation9 + $0x8] sm:$0xff] }
  0x2e   :  { %410 = vmatpush.bf16.msra.mxu2 %v1546_v25 }
  0x2f   :  { %498 = vmatpush.bf16.msra.mxu3 %v1555_v34  ;;  %v1579_v34 = vld [vmem:[#allocation9 + $0x18] sm:$0xff] }
  0x30   :  { %218 = vmatpush.bf16.msra.mxu0 %v1529_v20  ;;  %322 = vmatpush.bf16.msra.mxu1 %v1537_v21  ;;  %v1568_v20 = vld [vmem:[#allocation9] sm:$0xff]  ;;  %v1583_v21 = vld [vmem:[#allocation9 + $0x38] sm:$0xff] }
  0x32   :  { %411 = vmatpush.bf16.msra.mxu2 %v1545_v26 }
  0x33   :  { %499 = vmatpush.bf16.msra.mxu3 %v1554_v44  ;;  %v1588_v44 = vld [vmem:[#allocation9 + $0x20] sm:$0xff] }
  0x34   :  { %219 = vmatpush.bf16.msra.mxu0 %v1528_v22  ;;  %323 = vmatpush.bf16.msra.mxu1 %v1536_v23  ;;  %v688_v22 = vsel %vm687_vm7, 1, %v1811_v2  ;;  %v1582_v23 = vld [vmem:[#allocation9 + $0x30] sm:$0xff] }
  0x35   :  { %690 = vperm.xlu2 %1628, %v688_v22  }
  0x36   :  { %412 = vmatpush.bf16.msra.mxu2 %v1544_v27 }
  0x37   :  { %220 = vmatmul.bf16.vlgmr.msra.gmra.mxu0 %v1524_v24  ;;  %324 = vmatmul.bf16.vlgmr.msra.gmra.mxu1 %v1811_v2  ;;  %v1581_v24 = vld [vmem:[#allocation9 + $0x28] sm:$0xff] }
  0x38   :  { %500 = vmatpush.bf16.msra.mxu3 %v1553_v45  ;;  %583 = vmatpush.bf16.msrb.mxu1 %v1567_v48  ;;  %v1587_v45 = vld [vmem:[#allocation9 + $0x18] sm:$0xff]  ;;  %v1586_v48 = vld [vmem:[#allocation9 + $0x10] sm:$0xff] }
  0x3a   :  { %672 = vmatpush.bf16.msrb.mxu2 %v1575_v1 }
  0x3c   :  { %501 = vmatpush.bf16.msra.mxu3 %v1552_v47  ;;  %584 = vmatpush.bf16.msrb.mxu1 %v1566_v50 }
  0x3e   :  { %673 = vmatpush.bf16.msrb.mxu2 %v1574_v4 }
  0x40   :  { %585 = vmatpush.bf16.msrb.mxu1 %v1565_v51  ;;  %761 = vmatpush.bf16.msrb.mxu3 %v1583_v21  ;;  %v1585_v51 = vld [vmem:[#allocation9 + $0x8] sm:$0xff] }
  0x42   :  { %674 = vmatpush.bf16.msrb.mxu2 %v1573_v6 }
  0x44   :  { %586 = vmatpush.bf16.msrb.mxu1 %v1564_v60  ;;  %762 = vmatpush.bf16.msrb.mxu3 %v1582_v23  ;;  %v1597_v60 = vld [vmem:[#allocation9 + $0x28] sm:$0xff] }
  0x45   :  { %v1605_v23 = vld [vmem:[#allocation10 + $0x28] sm:$0xff] }
  0x46   :  { %675 = vmatpush.bf16.msrb.mxu2 %v1572_v7 }
  0x47   :  { %225 = vmatmul.bf16.gmra.mxu0 %v1525_v46 }
  0x48   :  { %587 = vmatpush.bf16.msrb.mxu1 %v1563_v61  ;;  %763 = vmatpush.bf16.msrb.mxu3 %v1581_v24  ;;  %v1596_v61 = vld [vmem:[#allocation9 + $0x20] sm:$0xff]  ;;  %v1603_v24 = vld [vmem:[#allocation10 + $0x18] sm:$0xff] }
  0x4a   :  { %676 = vmatpush.bf16.msrb.mxu2 %v1571_v8 }
  0x4c   :  { %588 = vmatpush.bf16.msrb.mxu1 %v1562_v62  ;;  %764 = vmatpush.bf16.msrb.mxu3 %v1580_v33  ;;  %v1595_v62 = vld [vmem:[#allocation9 + $0x18] sm:$0xff] }
  0x4e   :  { %677 = vmatpush.bf16.msrb.mxu2 %v1570_v17 }
  0x50   :  { %589 = vmatpush.bf16.msrb.mxu1 %v1561_v63  ;;  %765 = vmatpush.bf16.msrb.mxu3 %v1579_v34 }
  0x52   :  { %678 = vmatpush.bf16.msrb.mxu2 %v1569_v18 }
  0x54   :  { %590 = vmatpush.bf16.msrb.mxu1 %v1560_v0 }
  0x56   :  { %679 = vmatpush.bf16.msrb.mxu2 %v1568_v20 }
  0x57   :  { %230 = vmatmul.bf16.gmra.mxu0 %v1526_v19 }
  0x8d   :  { %v335_v40 = vpop.permute.xlu0 %334  ;;  %v513_v13 = vpop.permute.xlu1 %512 }
  0x8e   :  { %vm336_vm2 = vcmp.eq.s32.totalorder %v335_v40, 1  ;;  %vm514_vm6 = vcmp.eq.s32.totalorder %v513_v13, 1  ;;  %v777_v40 = vsel %vm776_vm9, 1, %v1811_v2  ;;  %v955_v13 = vsel %vm954_vm13, 1, %v1811_v2 }
  0x8f   :  { %779 = vperm.xlu2 %1628, %v777_v40   ;;  %957 = vperm.xlu1 %1627, %v955_v13  }
  0x95   :  { %v424_v56 = vpop.permute.xlu0 %423 }
  0x96   :  { %vm425_vm4 = vcmp.eq.s32.totalorder %v424_v56, 1  ;;  %v1584_v56 = vld [vmem:[#allocation9] sm:$0xff] }
  0x97   :  { %v602_v29 = vpop.permute.xlu1 %601 }
  0x98   :  { %vm603_vm8 = vcmp.eq.s32.totalorder %v602_v29, 1  ;;  %v1614_v29 = vld [vmem:[#allocation12 + $0x30] sm:$0xff] }
  0xb4   :  { %v221_v36 = vpop.f32.mrf.mxu0  ;;  %v325_v37 = vpop.f32.mrf.mxu1 }
  0xb5   :  { %v222_v38 = vadd.f32 %v1895_v35, %v221_v36  ;;  %v1578_v36 = vld [vmem:[#allocation9 + $0x10] sm:$0xff] }
  0xb6   :  { %766 = vmatpush.bf16.msrb.mxu3 %v1578_v36  ;;  %v1611_v36 = vld [vmem:[#allocation12 + $0x18] sm:$0xff] }
  0xb7   :  { %v329_v39 = vadd.f32 %v325_v37, %v222_v38  ;;  %v1577_v37 = vld [vmem:[#allocation9 + $0x8] sm:$0xff]  ;;  %v1576_v38 = vld [vmem:[#allocation9] sm:$0xff] }
  0xb9   :  { %1632 = vtanh.f32 %v329_v39  ;;  %v1591_v39 = vld [vmem:[#allocation9 + $0x38] sm:$0xff] }
  0xba   :  { %767 = vmatpush.bf16.msrb.mxu3 %v1577_v37  ;;  %850 = vmatpush.bf16.msrb.mxu0 %v1591_v39 }
  0xbc   :  { %v327_v41 = vpop.f32.mrf.mxu1  ;;  %v223_v52 = vpop.f32.mrf.mxu0 }
  0xbd   :  { %v224_v53 = vadd.f32 %v1895_v35, %v223_v52  ;;  %v1527_v41 = vld [vmem:[#allocation4 + $0x18] sm:$0xff]  ;;  %v691_v52 = vpop.permute.xlu2 %690 }
  0xbe   :  { %768 = vmatpush.bf16.msrb.mxu3 %v1576_v38  ;;  %235 = vmatmul.bf16.gmra.mxu0 %v1527_v41  ;;  %vm692_vm10 = vcmp.eq.s32.totalorder %v691_v52, 1  ;;  %v1610_v38 = vld [vmem:[#allocation12 + $0x10] sm:$0xff] }
  0xbf   :  { %v1633_v42 = vpop.eup %1632 }
  0xc0   :  { %337 = vst.msk [vmem:[#allocation3] sm:$0xff] %vm336_vm2, %v1633_v42  ;;  %v340_v43 = vpack.c.bf16 %v1633_v42, %v1633_v42  ;;  %v1590_v42 = vld [vmem:[#allocation9 + $0x30] sm:$0xff] }
  0xc1   :  { %851 = vmatpush.bf16.msrb.mxu0 %v1590_v42 }
  0xc2   :  { %413 = vmatmul.bf16.vlgmr.msra.gmra.mxu2 %v340_v43  ;;  %v1589_v43 = vld [vmem:[#allocation9 + $0x28] sm:$0xff] }
  0xc4   :  { %v226_v9 = vpop.f32.mrf.mxu0 }
  0xc5   :  { %v227_v10 = vadd.f32 %v1895_v35, %v226_v9  ;;  %852 = vmatpush.bf16.msrb.mxu0 %v1589_v43  ;;  %v1594_v9 = vld [vmem:[#allocation9 + $0x10] sm:$0xff]  ;;  %v1609_v43 = vld [vmem:[#allocation12 + $0x8] sm:$0xff] }
  0xc9   :  { %853 = vmatpush.bf16.msrb.mxu0 %v1588_v44  ;;  %v1608_v44 = vld [vmem:[#allocation12] sm:$0xff] }
  0xcc   :  { %v228_v25 = vpop.f32.mrf.mxu0 }
  0xcd   :  { %v229_v26 = vadd.f32 %v1895_v35, %v228_v25  ;;  %854 = vmatpush.bf16.msrb.mxu0 %v1587_v45  ;;  %v1602_v25 = vld [vmem:[#allocation10 + $0x10] sm:$0xff] }
  0xd1   :  { %855 = vmatpush.bf16.msrb.mxu0 %v1586_v48 }
  0xd4   :  { %v231_v46 = vpop.f32.mrf.mxu0 }
  0xd5   :  { %v232_v47 = vadd.f32 %v1895_v35, %v231_v46  ;;  %856 = vmatpush.bf16.msrb.mxu0 %v1585_v51 }
  0xd9   :  { %857 = vmatpush.bf16.msrb.mxu0 %v1584_v56 }
  0xdc   :  { %v233_v63 = vpop.f32.mrf.mxu0 }
  0xdd   :  { %v234_v0 = vadd.f32 %v1895_v35, %v233_v63 }
  0xe9   :  { %v780_v4 = vpop.permute.xlu2 %779 }
  0xea   :  { %vm781_vm12 = vcmp.eq.s32.totalorder %v780_v4, 1 }
 0x101   :  { %v958_v37 = vpop.permute.xlu1 %957 }
 0x102   :  { %vm959_vm15 = vcmp.eq.s32.totalorder %v958_v37, 1 }
 0x145   :  { %v414_v54 = vpop.f32.mrf.mxu2 }
 0x146   :  { %v418_v55 = vadd.f32 %v414_v54, %v224_v53 }
 0x148   :  { %1634 = vtanh.f32 %v418_v55 }
 0x14d   :  { %v416_v57 = vpop.f32.mrf.mxu2 }
 0x14e   :  { %v1635_v58 = vpop.eup %1634  ;;  %v1599_v57 = vld [vmem:[#allocation9 + $0x38] sm:$0xff] }
 0x14f   :  { %426 = vst.msk [vmem:[#allocation3] sm:$0xff] %vm425_vm4, %v1635_v58  ;;  %v429_v59 = vpack.c.bf16 %v1635_v58, %v1635_v58  ;;  %v866_v58 = vsel %vm865_vm11, 1, %v1811_v2  ;;  %939 = vmatpush.bf16.msra.mxu1 %v1599_v57  ;;  %v1604_v2 = vld [vmem:[#allocation10 + $0x20] sm:$0xff] }
 0x150   :  { %868 = vperm.xlu0 %1626, %v866_v58  }
 0x151   :  { %502 = vmatmul.bf16.vlgmr.msra.gmra.mxu3 %v429_v59  ;;  %v1598_v59 = vld [vmem:[#allocation9 + $0x30] sm:$0xff] }
 0x153   :  { %940 = vmatpush.bf16.msra.mxu1 %v1598_v59 }
 0x157   :  { %941 = vmatpush.bf16.msra.mxu1 %v1597_v60 }
 0x15b   :  { %942 = vmatpush.bf16.msra.mxu1 %v1596_v61 }
 0x15f   :  { %943 = vmatpush.bf16.msra.mxu1 %v1595_v62 }
 0x163   :  { %944 = vmatpush.bf16.msra.mxu1 %v1594_v9 }
 0x1c2   :  { %v869_v19 = vpop.permute.xlu0 %868 }
 0x1c3   :  { %vm870_vm14 = vcmp.eq.s32.totalorder %v869_v19, 1 }
 0x1d4   :  { %v503_v11 = vpop.f32.mrf.mxu3 }
 0x1d5   :  { %v507_v12 = vadd.f32 %v503_v11, %v227_v10  ;;  %v1593_v10 = vld [vmem:[#allocation9 + $0x8] sm:$0xff]  ;;  %v1592_v11 = vld [vmem:[#allocation9] sm:$0xff] }
 0x1d6   :  { %945 = vmatpush.bf16.msra.mxu1 %v1593_v10 }
 0x1d7   :  { %1636 = vtanh.f32 %v507_v12  ;;  %v1607_v12 = vld [vmem:[#allocation10 + $0x38] sm:$0xff] }
 0x1d8   :  { %1031 = vmatpush.bf16.msra.mxu2 %v1607_v12 }
 0x1da   :  { %946 = vmatpush.bf16.msra.mxu1 %v1592_v11 }
 0x1dc   :  { %v505_v14 = vpop.f32.mrf.mxu3  ;;  %1032 = vmatpush.bf16.msra.mxu2 %v1606_v5 }
 0x1dd   :  { %v1637_v15 = vpop.eup %1636  ;;  %v236_v14 = vpop.f32.mrf.mxu0 }
 0x1de   :  { %515 = vst.msk [vmem:[#allocation3] sm:$0xff] %vm514_vm6, %v1637_v15  ;;  %v518_v16 = vpack.c.bf16 %v1637_v15, %v1637_v15 }
 0x1e0   :  { %591 = vmatmul.bf16.vlgmr.msrb.gmra.mxu1 %v518_v16  ;;  %v237_v16 = vadd.f32 %v1895_v35, %v236_v14  ;;  %1033 = vmatpush.bf16.msra.mxu2 %v1605_v23 }
 0x1e4   :  { %1034 = vmatpush.bf16.msra.mxu2 %v1604_v2 }
 0x1e5   :  { %v238_v15 = vpop.f32.mrf.mxu0 }
 0x1e8   :  { %1035 = vmatpush.bf16.msra.mxu2 %v1603_v24 }
 0x1ec   :  { %1036 = vmatpush.bf16.msra.mxu2 %v1602_v25 }
 0x25d   :  { %v592_v27 = vpop.f32.mrf.mxu1 }
 0x25e   :  { %v596_v28 = vadd.f32 %v592_v27, %v229_v26  ;;  %v1601_v26 = vld [vmem:[#allocation10 + $0x8] sm:$0xff]  ;;  %v1600_v27 = vld [vmem:[#allocation10] sm:$0xff] }
 0x25f   :  { %1037 = vmatpush.bf16.msra.mxu2 %v1601_v26 }
 0x260   :  { %1638 = vtanh.f32 %v596_v28  ;;  %v1615_v28 = vld [vmem:[#allocation12 + $0x38] sm:$0xff] }
 0x261   :  { %1114 = vmatpush.bf16.msra.mxu3 %v1615_v28 }
 0x263   :  { %1038 = vmatpush.bf16.msra.mxu2 %v1600_v27 }
 0x265   :  { %v594_v30 = vpop.f32.mrf.mxu1  ;;  %1115 = vmatpush.bf16.msra.mxu3 %v1614_v29 }
 0x266   :  { %v1639_v31 = vpop.eup %1638  ;;  %v1613_v30 = vld [vmem:[#allocation12 + $0x28] sm:$0xff] }
 0x267   :  { %604 = vst.msk [vmem:[#allocation3] sm:$0xff] %vm603_vm8, %v1639_v31  ;;  %v607_v32 = vpack.c.bf16 %v1639_v31, %v1639_v31  ;;  %v1612_v31 = vld [vmem:[#allocation12 + $0x20] sm:$0xff] }
 0x269   :  { %680 = vmatmul.bf16.vlgmr.msrb.gmra.mxu2 %v607_v32  ;;  %1116 = vmatpush.bf16.msra.mxu3 %v1613_v30  ;;  %v239_v32 = vadd.f32 %v1895_v35, %v238_v15  ;;  %v1630_v35 = vld [vmem:[%s1932_s6] ss:$0 sm:$0xff]  ;;  %s1813_s6 = smov [#allocation13]  }
 0x26a   :  { %s1142_s16 = sshll.u32 %s1813_s6, 4  ;;  %s1143_s16 = int_to_ptr.vmem [resolvable:$true] %s1142_s16 }
 0x26d   :  { %1117 = vmatpush.bf16.msra.mxu3 %v1612_v31 }
 0x271   :  { %1118 = vmatpush.bf16.msra.mxu3 %v1611_v36 }
 0x275   :  { %1119 = vmatpush.bf16.msra.mxu3 %v1610_v38 }
 0x279   :  { %1120 = vmatpush.bf16.msra.mxu3 %v1609_v43 }
 0x27d   :  { %1121 = vmatpush.bf16.msra.mxu3 %v1608_v44 }
 0x2ec   :  { %v681_v49 = vpop.f32.mrf.mxu2 }
 0x2ed   :  { %v685_v50 = vadd.f32 %v681_v49, %v232_v47 }
 0x2ef   :  { %1640 = vtanh.f32 %v685_v50  ;;  %v1631_v50 = vld [vmem:[%s1934_s8] ss:$0 sm:$0xff] }
 0x2f4   :  { %v683_v53 = vpop.f32.mrf.mxu2 }
 0x2f5   :  { %v1641_v54 = vpop.eup %1640 }
 0x2f6   :  { %693 = vst.msk [vmem:[#allocation3] sm:$0xff] %vm692_vm10, %v1641_v54  ;;  %v696_v55 = vpack.c.bf16 %v1641_v54, %v1641_v54 }
 0x2f8   :  { %769 = vmatmul.bf16.vlgmr.msrb.gmra.mxu3 %v696_v55 }
 0x37b   :  { %v770_v1 = vpop.f32.mrf.mxu3 }
 0x37c   :  { %v774_v3 = vadd.f32 %v770_v1, %v234_v0 }
 0x37e   :  { %1642 = vtanh.f32 %v774_v3 }
 0x383   :  { %v772_v6 = vpop.f32.mrf.mxu3 }
 0x384   :  { %v1643_v7 = vpop.eup %1642 }
 0x385   :  { %782 = vst.msk [vmem:[#allocation3] sm:$0xff] %vm781_vm12, %v1643_v7  ;;  %v785_v8 = vpack.c.bf16 %v1643_v7, %v1643_v7 }
 0x387   :  { %858 = vmatmul.bf16.vlgmr.msrb.gmra.mxu0 %v785_v8 }
 0x404   :  { %v859_v17 = vpop.f32.mrf.mxu0 }
 0x405   :  { %v863_v18 = vadd.f32 %v859_v17, %v237_v16 }
 0x407   :  { %1644 = vtanh.f32 %v863_v18 }
 0x40c   :  { %v861_v20 = vpop.f32.mrf.mxu0 }
 0x40d   :  { %v1645_v21 = vpop.eup %1644 }
 0x40e   :  { %871 = vst.msk [vmem:[#allocation3] sm:$0xff] %vm870_vm14, %v1645_v21  ;;  %v874_v22 = vpack.c.bf16 %v1645_v21, %v1645_v21 }
 0x410   :  { %947 = vmatmul.bf16.vlgmr.msra.gmra.mxu1 %v874_v22 }
 0x48d   :  { %v948_v33 = vpop.f32.mrf.mxu1 }
 0x48e   :  { %v952_v34 = vadd.f32 %v948_v33, %v239_v32 }
 0x490   :  { %1646 = vtanh.f32 %v952_v34 }
 0x495   :  { %v950_v39 = vpop.f32.mrf.mxu1 }
 0x496   :  { %v1647_v40 = vpop.eup %1646 }
 0x497   :  { %960 = vst.msk [vmem:[#allocation3] sm:$0xff] %vm959_vm15, %v1647_v40 }
 0x49e   :  { %v961_v41 = vld [vmem:[#allocation3] sm:$0xff] }
 0x49f   :  { %v962_v42 = vpack.c.bf16 %v961_v41, %v961_v41 }
 0x4a1   :  { %1039 = vmatmul.bf16.vlgmr.msra.gmra.mxu2 %v962_v42 }
 0x524   :  { %v1040_v45 = vpop.f32.mrf.mxu2 }
 0x525   :  { %v1041_v46 = vadd.f32 %v1630_v35, %v1040_v45 }
 0x527   :  { %v1044_v47 = vmax.f32 %v1041_v46, 0.0 }
 0x529   :  { %v1045_v48 = vpack.c.bf16 %v1044_v47, %v1044_v47 }
 0x52b   :  { %1122 = vmatmul.bf16.vlgmr.msra.gmra.mxu3 %v1045_v48 }
 0x52c   :  { %v1042_v49 = vpop.f32.mrf.mxu2 }
 0x5ae   :  { %v1123_v51 = vpop.f32.mrf.mxu3 }
 0x5af   :  { %v1124_v52 = vadd.f32 %v1631_v50, %v1123_v51 }
 0x5b1   :  { %1127 = vmax.xlane.f32.xlu2 %v1124_v52 }
 0x5b6   :  { %v1125_v53 = vpop.f32.mrf.mxu3 }
 0x624   :  { %v1128_v54 = vpop.xlane.xlu2 %1127 }
 0x625   :  { %v1129_v55 = vsub.f32 %v1124_v52, %v1128_v54 }
 0x627   :  { %v1130_v56 = vmul.f32 1.442695, %v1129_v55 }
 0x629   :  { %1648 = vpow2.f32 %v1130_v56 }
 0x62f   :  { %v1649_v57 = vpop.eup %1648 }
 0x630   :  { %1132 = vadd.xlane.f32.xlu0 %v1649_v57 }
 0x6a3   :  { %v1133_v58 = vpop.xlane.xlu0 %1132 }
 0x6a4   :  { %1650 = vrcp.f32 %v1133_v58 }
 0x6aa   :  { %v1651_v59 = vpop.eup %1650 }
 0x6ab   :  { %v1135_v60 = vmul.f32 %v1651_v59, %v1649_v57 }
 0x6ad   :  { %1136 = vst [vmem:[#allocation13] sm:$0xff] %v1135_v60 }
 0x6ae   :  { %1147 = dma.vmem_to_hbm [thread:$0]  %s1143_s16, 128, %s1145_s19, [#allocation6]  }
 0x6af   :  { %1802 = dma.done.wait [#allocation6], 128  }
 0x6b0   :  { %1803 = vsyncadd [#allocation6], 4294967168 }
 0x6b1   :  { %1152 = vsyncpa [#allocation5], 1 }
 0x6b2   :  { %1153 = vsyncpa [#allocation8], 1 }
 0x6b3   :  { %1154 = vsyncpa [#allocation11], 1 }
 0x6b4   :  { %1155 = vsyncpa [#allocation6], 1 }

</bundles_post_ra>
